<compile_context>
chip_gen: v5e
topology: v5e:2x2
jax: 0.10.0
libtpu: 0.0.40
codegen_flags: <defaults>
</compile_context>

<pallas_src>
import jax
import jax.numpy as jnp
from jax.experimental import pallas as pl
from jax.experimental.pallas import tpu as pltpu


# -----------------------------------------------------------------------------
# Kernel
# -----------------------------------------------------------------------------
def make_fused_bilstm_kernel(num_layers, hidden_size):
    H = hidden_size

    def kernel(*refs):
        # refs = (x, w0, b0, ..., w_{L-1}, b_{L-1}, fc_w, fc_b, out)
        x_ref = refs[0]
        layer_refs = refs[1:1 + 2 * num_layers]
        fc_w_ref, fc_b_ref, out_ref = refs[1 + 2 * num_layers:]

        h = x_ref[...]                                   # (bb, d_in), f32
        for layer in range(num_layers):
            w = layer_refs[2 * layer][...]               # (d_in, 6H) gate-major
            b = layer_refs[2 * layer + 1][...]           # (1, 6H)
            gates = jnp.dot(h, w, preferred_element_type=jnp.float32) + b

            # Single sigmoid pass over [i_fwd|i_rev|o_fwd|o_rev], single tanh
            # pass over [g_fwd|g_rev]: 6H EUP columns total per layer.
            s = jax.nn.sigmoid(gates[:, :4 * H])         # (bb, 4H)
            g = jnp.tanh(gates[:, 4 * H:])               # (bb, 2H)
            i = s[:, :2 * H]                             # (bb, 2H)
            o = s[:, 2 * H:]                             # (bb, 2H)
            # c = f*c0 + i*g with c0 == 0; result is already [h_fwd | h_rev].
            h = o * jnp.tanh(i * g)                      # (bb, 2H), stays in vregs

        # seq_len == 1 => out[-1, :, :] is just h; fused FC (class axis padded
        # to 128 lanes so this single HBM write is an unmasked vst).
        out_ref[...] = (jnp.dot(h, fc_w_ref[...],
                                preferred_element_type=jnp.float32)
                        + fc_b_ref[...])

    return kernel


# -----------------------------------------------------------------------------
# Parameter init (PyTorch shapes) and kernel-side packing
# -----------------------------------------------------------------------------
def init_bilstm_params(key, input_size, hidden_size, num_layers, num_classes):
    """Deterministic init mirroring nn.LSTM / nn.Linear parameter shapes
    (raw, un-packed — used by the pure-JAX reference)."""
    H = hidden_size
    bound = 1.0 / float(H) ** 0.5  # PyTorch LSTM default U(-1/sqrt(H), 1/sqrt(H))

    def u(k_, shape, b):
        return jax.random.uniform(k_, shape, jnp.float32, -b, b)

    raw = {"layers": []}
    for layer in range(num_layers):
        d_in = input_size if layer == 0 else 2 * H
        key, *subs = jax.random.split(key, 9)
        dirs = []
        for d in range(2):  # 0 = forward, 1 = reverse
            w_ih = u(subs[4 * d + 0], (4 * H, d_in), bound)
            w_hh = u(subs[4 * d + 1], (4 * H, H), bound)   # dead: h0==0, T==1
            b_ih = u(subs[4 * d + 2], (4 * H,), bound)
            b_hh = u(subs[4 * d + 3], (4 * H,), bound)
            dirs.append((w_ih, w_hh, b_ih, b_hh))
        raw["layers"].append(tuple(dirs))

    key, k1, k2 = jax.random.split(key, 3)
    fc_bound = 1.0 / float(2 * H) ** 0.5
    raw["fc"] = (u(k1, (num_classes, 2 * H), fc_bound),    # nn.Linear weight
                 u(k2, (num_classes,), fc_bound))
    return raw


def pack_params(raw, hidden_size, num_classes):
    """Pack raw PyTorch-shaped params for the kernel:
       * dead f-gate and W_hh pruned (exact for seq_len==1, h0==c0==0),
       * gate-major / direction-minor column order [i_f|i_r|o_f|o_r|g_f|g_r],
       * FC class axis zero-padded to a full 128-lane vreg."""
    H = hidden_size

    def gate_cols(w_ih, idx):          # PyTorch gate row order: i=0, f=1, g=2, o=3
        return w_ih[idx * H:(idx + 1) * H].T          # (d_in, H)

    def gate_bias(b, idx):
        return b[idx * H:(idx + 1) * H]

    packed = {"layers": []}
    for dirs in raw["layers"]:
        (w_f, _, bi_f, bh_f), (w_r, _, bi_r, bh_r) = dirs
        bf, br = bi_f + bh_f, bi_r + bh_r
        w_packed = jnp.concatenate(
            [gate_cols(w_f, 0), gate_cols(w_r, 0),    # i
             gate_cols(w_f, 3), gate_cols(w_r, 3),    # o
             gate_cols(w_f, 2), gate_cols(w_r, 2)],   # g
            axis=1)                                   # (d_in, 6H)
        b_packed = jnp.concatenate(
            [gate_bias(bf, 0), gate_bias(br, 0),
             gate_bias(bf, 3), gate_bias(br, 3),
             gate_bias(bf, 2), gate_bias(br, 2)]).reshape(1, -1)  # (1, 6H)
        packed["layers"].append((w_packed, b_packed))

    fc_w, fc_b = raw["fc"]
    padded_nc = max(128, ((num_classes + 127) // 128) * 128)   # lane-dense out
    fc_w_p = jnp.zeros((2 * H, padded_nc), jnp.float32).at[:, :num_classes].set(fc_w.T)
    fc_b_p = jnp.zeros((1, padded_nc), jnp.float32).at[0, :num_classes].set(fc_b)
    packed["fc"] = (fc_w_p, fc_b_p)
    return packed


# -----------------------------------------------------------------------------
# Wrapper
# -----------------------------------------------------------------------------
def bilstm_forward(x, packed, hidden_size, num_classes, *, block_b=1024,
                   vmem_limit_bytes=32 * 1024 * 1024):
    """Single fused pallas_call: all BiLSTM layers + FC (class axis padded)."""
    x = x.astype(jnp.float32)
    B, d_in = x.shape
    H = hidden_size
    num_layers = len(packed["layers"])
    fc_w, fc_b = packed["fc"]
    padded_nc = fc_w.shape[1]

    # Batch tile.  bigger tiles amortize the ~0.35us/step grid overhead
    # (v5e/v6e have 128 MiB VMEM: block_b / vmem_limit can be raised freely);
    # if the whole batch would fit in one tile and B is large enough, split it
    # in two so v7x's second TensorCore gets work (64 MiB VMEM: keep the limit
    # <= ~48 MiB there).
    if B <= block_b:
        bb = B
        if B >= 16 and B % 16 == 0:
            bb = B // 2
    else:
        bb = max(8, (min(block_b, B) // 8) * 8)
    grid = (pl.cdiv(B, bb),)
    # TODO(synk): on v7x with grid >= 2, switch the batch axis to
    # pltpu.CORE_PARALLEL for guaranteed 2-TC sharding.

    layer_args = []
    for (w, b) in packed["layers"]:
        layer_args += [w, b]
    args = [x] + layer_args + [fc_w, fc_b]

    in_specs = [pl.BlockSpec((bb, d_in), lambda i: (i, 0))]
    # Weights / biases: constant index_map -> VMEM-resident across batch tiles.
    for a in layer_args + [fc_w, fc_b]:
        in_specs.append(pl.BlockSpec(a.shape, lambda i: (0, 0)))

    out_specs = pl.BlockSpec((bb, padded_nc), lambda i: (i, 0))

    kernel = make_fused_bilstm_kernel(num_layers, H)

    out_padded = pl.pallas_call(
        kernel,
        grid=grid,
        in_specs=in_specs,
        out_specs=out_specs,
        out_shape=jax.ShapeDtypeStruct((B, padded_nc), jnp.float32),
        compiler_params=pltpu.CompilerParams(
            dimension_semantics=("parallel",),     # megacore / 2-TC sharding
            vmem_limit_bytes=vmem_limit_bytes,
        ),
    )(*args)

    return out_padded[:, :num_classes]


# -----------------------------------------------------------------------------
# Pure-JAX reference on the RAW (PyTorch-shaped) params — independent check
# -----------------------------------------------------------------------------
def reference_forward(x, raw, hidden_size):
    H = hidden_size
    h = x.astype(jnp.float32)
    for dirs in raw["layers"]:
        outs = []
        for (w_ih, _w_hh, b_ih, b_hh) in dirs:    # W_hh term vanishes: h0 == 0
            gates = h @ w_ih.T + b_ih + b_hh
            i = jax.nn.sigmoid(gates[:, 0 * H:1 * H])
            # f-gate multiplies c0 == 0 -> drops out of c exactly.
            g = jnp.tanh(gates[:, 2 * H:3 * H])
            o = jax.nn.sigmoid(gates[:, 3 * H:4 * H])
            c = i * g
            outs.append(o * jnp.tanh(c))
        h = jnp.concatenate(outs, axis=-1)        # [h_fwd | h_rev]
    fc_w, fc_b = raw["fc"]
    return h @ fc_w.T + fc_b


if __name__ == "__main__":
    batch, input_size, hidden_size, num_layers, num_classes = 2, 16, 32, 2, 8

    key = jax.random.PRNGKey(0)
    kx, kp = jax.random.split(key)
    x = jax.random.normal(kx, (batch, input_size), jnp.float32)
    raw_params = init_bilstm_params(kp, input_size, hidden_size, num_layers,
                                    num_classes)
    packed_params = pack_params(raw_params, hidden_size, num_classes)

    out = bilstm_forward(x, packed_params, hidden_size, num_classes)
    out = jax.block_until_ready(out)

    ref = reference_forward(x, raw_params, hidden_size)
    assert out.shape == (batch, num_classes), out.shape
    assert jnp.allclose(out, ref, atol=1e-5, rtol=1e-5), (
        "Pallas output mismatch vs reference")

    print("KERNEL_OK")
</pallas_src>

<mosaic_0001>
module attributes {stable_mosaic.version = 11 : i64} {
  func.func @kernel(%arg0: i32, %arg1: memref<2x16xf32, #tpu.memory_space<vmem>>, %arg2: memref<16x192xf32, #tpu.memory_space<vmem>>, %arg3: memref<1x192xf32, #tpu.memory_space<vmem>>, %arg4: memref<64x192xf32, #tpu.memory_space<vmem>>, %arg5: memref<1x192xf32, #tpu.memory_space<vmem>>, %arg6: memref<64x128xf32, #tpu.memory_space<vmem>>, %arg7: memref<1x128xf32, #tpu.memory_space<vmem>>, %arg8: memref<2x128xf32, #tpu.memory_space<vmem>>) attributes {dimension_semantics = [#tpu.dimension_semantics<parallel>], iteration_bounds = array<i64: 1>, scalar_prefetch = 0 : i64, scratch_operands = 0 : i64, tpu.core_type = #tpu.core_type<tc>, window_params = [{transform_indices = @transform_0, window_bounds = array<i64: 2, 16>}, {pipeline_mode = #tpu.pipeline_mode<synchronous>, transform_indices = @transform_1, window_bounds = array<i64: 16, 192>}, {pipeline_mode = #tpu.pipeline_mode<synchronous>, transform_indices = @transform_2, window_bounds = array<i64: 1, 192>}, {pipeline_mode = #tpu.pipeline_mode<synchronous>, transform_indices = @transform_3, window_bounds = array<i64: 64, 192>}, {pipeline_mode = #tpu.pipeline_mode<synchronous>, transform_indices = @transform_4, window_bounds = array<i64: 1, 192>}, {pipeline_mode = #tpu.pipeline_mode<synchronous>, transform_indices = @transform_5, window_bounds = array<i64: 64, 128>}, {pipeline_mode = #tpu.pipeline_mode<synchronous>, transform_indices = @transform_6, window_bounds = array<i64: 1, 128>}, {transform_indices = @transform_7, window_bounds = array<i64: 2, 128>}]} {
    %c0 = arith.constant 0 : index
    %c0_0 = arith.constant 0 : index
    %0 = vector.load %arg1[%c0, %c0_0] : memref<2x16xf32, #tpu.memory_space<vmem>>, vector<2x16xf32>
    %c0_1 = arith.constant 0 : index
    %c0_2 = arith.constant 0 : index
    %1 = vector.load %arg2[%c0_1, %c0_2] : memref<16x192xf32, #tpu.memory_space<vmem>>, vector<16x192xf32>
    %c0_3 = arith.constant 0 : index
    %c0_4 = arith.constant 0 : index
    %2 = vector.load %arg3[%c0_3, %c0_4] : memref<1x192xf32, #tpu.memory_space<vmem>>, vector<1x192xf32>
    %cst = arith.constant dense<0.000000e+00> : vector<2x192xf32>
    %3 = tpu.matmul %0, %1, %cst {dimension_numbers = #tpu.dot_dimension_numbers<[1], [0], [0], [1], [0, 0, 1, 1], [], []>} : vector<2x16xf32>, vector<16x192xf32>, vector<2x192xf32> -> vector<2x192xf32>
    %4 = vector.broadcast %2 : vector<1x192xf32> to vector<2x192xf32>
    %5 = arith.addf %3, %4 : vector<2x192xf32>
    %6 = vector.extract_strided_slice %5 {offsets = [0, 0], sizes = [2, 128], strides = [1, 1]} : vector<2x192xf32> to vector<2x128xf32>
    %7 = arith.negf %6 : vector<2x128xf32>
    %8 = math.exp %7 : vector<2x128xf32>
    %cst_5 = arith.constant 1.000000e+00 : f32
    %9 = vector.broadcast %cst_5 : f32 to vector<2x128xf32>
    %10 = arith.addf %9, %8 : vector<2x128xf32>
    %11 = arith.divf %9, %10 : vector<2x128xf32>
    %12 = vector.extract_strided_slice %5 {offsets = [0, 128], sizes = [2, 64], strides = [1, 1]} : vector<2x192xf32> to vector<2x64xf32>
    %13 = math.tanh %12 : vector<2x64xf32>
    %14 = vector.extract_strided_slice %11 {offsets = [0, 0], sizes = [2, 64], strides = [1, 1]} : vector<2x128xf32> to vector<2x64xf32>
    %15 = vector.extract_strided_slice %11 {offsets = [0, 64], sizes = [2, 64], strides = [1, 1]} : vector<2x128xf32> to vector<2x64xf32>
    %16 = arith.mulf %14, %13 : vector<2x64xf32>
    %17 = math.tanh %16 : vector<2x64xf32>
    %18 = arith.mulf %15, %17 : vector<2x64xf32>
    %c0_6 = arith.constant 0 : index
    %c0_7 = arith.constant 0 : index
    %19 = vector.load %arg4[%c0_6, %c0_7] : memref<64x192xf32, #tpu.memory_space<vmem>>, vector<64x192xf32>
    %c0_8 = arith.constant 0 : index
    %c0_9 = arith.constant 0 : index
    %20 = vector.load %arg5[%c0_8, %c0_9] : memref<1x192xf32, #tpu.memory_space<vmem>>, vector<1x192xf32>
    %cst_10 = arith.constant dense<0.000000e+00> : vector<2x192xf32>
    %21 = tpu.matmul %18, %19, %cst_10 {dimension_numbers = #tpu.dot_dimension_numbers<[1], [0], [0], [1], [0, 0, 1, 1], [], []>} : vector<2x64xf32>, vector<64x192xf32>, vector<2x192xf32> -> vector<2x192xf32>
    %22 = vector.broadcast %20 : vector<1x192xf32> to vector<2x192xf32>
    %23 = arith.addf %21, %22 : vector<2x192xf32>
    %24 = vector.extract_strided_slice %23 {offsets = [0, 0], sizes = [2, 128], strides = [1, 1]} : vector<2x192xf32> to vector<2x128xf32>
    %25 = arith.negf %24 : vector<2x128xf32>
    %26 = math.exp %25 : vector<2x128xf32>
    %cst_11 = arith.constant 1.000000e+00 : f32
    %27 = vector.broadcast %cst_11 : f32 to vector<2x128xf32>
    %28 = arith.addf %27, %26 : vector<2x128xf32>
    %29 = arith.divf %27, %28 : vector<2x128xf32>
    %30 = vector.extract_strided_slice %23 {offsets = [0, 128], sizes = [2, 64], strides = [1, 1]} : vector<2x192xf32> to vector<2x64xf32>
    %31 = math.tanh %30 : vector<2x64xf32>
    %32 = vector.extract_strided_slice %29 {offsets = [0, 0], sizes = [2, 64], strides = [1, 1]} : vector<2x128xf32> to vector<2x64xf32>
    %33 = vector.extract_strided_slice %29 {offsets = [0, 64], sizes = [2, 64], strides = [1, 1]} : vector<2x128xf32> to vector<2x64xf32>
    %34 = arith.mulf %32, %31 : vector<2x64xf32>
    %35 = math.tanh %34 : vector<2x64xf32>
    %36 = arith.mulf %33, %35 : vector<2x64xf32>
    %c0_12 = arith.constant 0 : index
    %c0_13 = arith.constant 0 : index
    %37 = vector.load %arg6[%c0_12, %c0_13] : memref<64x128xf32, #tpu.memory_space<vmem>>, vector<64x128xf32>
    %cst_14 = arith.constant dense<0.000000e+00> : vector<2x128xf32>
    %38 = tpu.matmul %36, %37, %cst_14 {dimension_numbers = #tpu.dot_dimension_numbers<[1], [0], [0], [1], [0, 0, 1, 1], [], []>} : vector<2x64xf32>, vector<64x128xf32>, vector<2x128xf32> -> vector<2x128xf32>
    %c0_15 = arith.constant 0 : index
    %c0_16 = arith.constant 0 : index
    %39 = vector.load %arg7[%c0_15, %c0_16] : memref<1x128xf32, #tpu.memory_space<vmem>>, vector<1x128xf32>
    %40 = vector.broadcast %39 : vector<1x128xf32> to vector<2x128xf32>
    %41 = arith.addf %38, %40 : vector<2x128xf32>
    %c0_17 = arith.constant 0 : index
    %c0_18 = arith.constant 0 : index
    %42 = vector.load %arg8[%c0_17, %c0_18] : memref<2x128xf32, #tpu.memory_space<vmem>>, vector<2x128xf32>
    tpu.vector_store %arg8[%c0_17, %c0_18], %41 {strides = array<i32>} : memref<2x128xf32, #tpu.memory_space<vmem>>, vector<2x128xf32>,
    return
  }
  func.func @transform_0(%arg0: i32) -> (i32, i32) {
    %c0_i32 = arith.constant 0 : i32
    %c0_i32_0 = arith.constant 0 : i32
    return %arg0, %c0_i32 : i32, i32
  }
  func.func @transform_1(%arg0: i32) -> (i32, i32) {
    %c0_i32 = arith.constant 0 : i32
    %c0_i32_0 = arith.constant 0 : i32
    %c0_i32_1 = arith.constant 0 : i32
    return %c0_i32, %c0_i32_0 : i32, i32
  }
  func.func @transform_2(%arg0: i32) -> (i32, i32) {
    %c0_i32 = arith.constant 0 : i32
    %c0_i32_0 = arith.constant 0 : i32
    %c0_i32_1 = arith.constant 0 : i32
    return %c0_i32, %c0_i32_0 : i32, i32
  }
  func.func @transform_3(%arg0: i32) -> (i32, i32) {
    %c0_i32 = arith.constant 0 : i32
    %c0_i32_0 = arith.constant 0 : i32
    %c0_i32_1 = arith.constant 0 : i32
    return %c0_i32, %c0_i32_0 : i32, i32
  }
  func.func @transform_4(%arg0: i32) -> (i32, i32) {
    %c0_i32 = arith.constant 0 : i32
    %c0_i32_0 = arith.constant 0 : i32
    %c0_i32_1 = arith.constant 0 : i32
    return %c0_i32, %c0_i32_0 : i32, i32
  }
  func.func @transform_5(%arg0: i32) -> (i32, i32) {
    %c0_i32 = arith.constant 0 : i32
    %c0_i32_0 = arith.constant 0 : i32
    %c0_i32_1 = arith.constant 0 : i32
    return %c0_i32, %c0_i32_0 : i32, i32
  }
  func.func @transform_6(%arg0: i32) -> (i32, i32) {
    %c0_i32 = arith.constant 0 : i32
    %c0_i32_0 = arith.constant 0 : i32
    %c0_i32_1 = arith.constant 0 : i32
    return %c0_i32, %c0_i32_0 : i32, i32
  }
  func.func @transform_7(%arg0: i32) -> (i32, i32) {
    %c0_i32 = arith.constant 0 : i32
    %c0_i32_0 = arith.constant 0 : i32
    return %arg0, %c0_i32 : i32, i32
  }
}

</mosaic_0001>

<bundles_post_ra>
// kernel: tpu_custom_call.1
= control target key start
LH: loop header
LB: loop body
LE: loop exit
PB: predicated region body
PF: predicated region fallthrough
CT: control target
= control target key end

     0   :  { %12 = vsyncpa [#allocation3], 0  ;;  %s604_s0 = inlined_call_operand.hbm [shape: f32[2,16], index: 0, kind: input, shape index: {}]   ;;  %s605_s1 = inlined_call_operand.hbm [shape: f32[16,192], index: 1, kind: input, shape index: {}]   ;;  %s606_s2 = inlined_call_operand.hbm [shape: f32[1,192], index: 2, kind: input, shape index: {}]   ;;  %s607_s3 = inlined_call_operand.hbm [shape: f32[64,192], index: 3, kind: input, shape index: {}]   ;;  %s608_s4 = inlined_call_operand.vmem [shape: f32[1,192], index: 4, kind: input, shape index: {}]   ;;  %s609_s5 = inlined_call_operand.hbm [shape: f32[64,128], index: 5, kind: input, shape index: {}]   ;;  %s610_s6 = inlined_call_operand.vmem [shape: f32[1,128], index: 6, kind: input, shape index: {}]   ;;  %s611_s7 = inlined_call_operand.hbm [shape: f32[2,128], index: 7, kind: output, shape index: {}]  }
   0x1   :  { %13 = vsyncpa [#allocation6], 0 }
   0x2   :  { %14 = vsyncpa [#allocation9], 0  ;;  %s31_s26 = sshll.u32 %s605_s1, 4  ;;  %s32_s26 = int_to_ptr.hbm [resolvable:$true] %s31_s26 }
   0x3   :  { %15 = vsyncpa [#allocation4], 0  ;;  %s522_s27 = smov [#allocation5]   ;;  %s55_s8 = sshll.u32 %s607_s3, 4  ;;  %s56_s8 = int_to_ptr.hbm [resolvable:$true] %s55_s8 }
   0x4   :  { %s33_s28 = sshll.u32 %s522_s27, 4  ;;  %s523_s9 = smov 256   ;;  %s34_s28 = int_to_ptr.vmem [resolvable:$true] %s33_s28 }
   0x5   :  { %s524_s10 = smov 16   ;;  %s525_s11 = smov [#allocation8]  }
   0x6   :  { %39 = dma.hbm_to_vmem [thread:$0]  %s32_s26, 512, %s34_s28, [#allocation6], %s523_s9, %s523_s9, %s524_s10  }
   0x7   :  { %s57_s12 = sshll.u32 %s525_s11, 4  ;;  %s21_s15 = sshll.u32 %s604_s0, 4  ;;  %s58_s12 = int_to_ptr.vmem [resolvable:$true] %s57_s12  ;;  %s22_s15 = int_to_ptr.hbm [resolvable:$true] %s21_s15 }
   0x8   :  { %63 = dma.hbm_to_vmem [thread:$0]  %s56_s8, 2048, %s58_s12, [#allocation9], %s523_s9, %s523_s9, %s524_s10  }
   0x9   :  { %s45_s17 = sshll.u32 %s606_s2, 4  ;;  %s526_s18 = smov [#allocation2]   ;;  %s46_s17 = int_to_ptr.hbm [resolvable:$true] %s45_s17 }
   0xa   :  { %s23_s19 = sshll.u32 %s526_s18, 4  ;;  %s527_s3 = smov [#allocation7]   ;;  %s24_s19 = int_to_ptr.vmem [resolvable:$true] %s23_s19 }
   0xb   :  { %26 = dma.hbm_to_vmem [thread:$0]  %s22_s15, 32, %s24_s19, [#allocation3]  }
   0xc   :  { %s47_s20 = sshll.u32 %s527_s3, 4  ;;  %s70_s23 = sshll.u32 %s609_s5, 4  ;;  %s48_s20 = int_to_ptr.vmem [resolvable:$true] %s47_s20  ;;  %s71_s23 = int_to_ptr.hbm [resolvable:$true] %s70_s23 }
   0xd   :  { %50 = dma.hbm_to_vmem [thread:$0]  %s46_s17, 32, %s48_s20, [#allocation6]  }
   0xe   :  { %s528_s0 = smov [#allocation10]   ;;  %s529_s25 = smov 128  }
   0xf   :  { %s72_s24 = sshll.u32 %s528_s0, 4  ;;  %s530_s26 = smov 8   ;;  %s73_s24 = int_to_ptr.vmem [resolvable:$true] %s72_s24 }
  0x10   :  { %78 = dma.hbm_to_vmem [thread:$0]  %s71_s23, 1024, %s73_s24, [#allocation9], %s529_s25, %s529_s25, %s530_s26  }
  0x11   :  { %514 = dma.done.wait [#allocation3], 32  }
  0x12   :  { %515 = vsyncadd [#allocation3], 4294967264 }
  0x13   :  { %516 = dma.done.wait [#allocation6], 544  }
  0x14   :  { %517 = vsyncadd [#allocation6], 4294966752 }
  0x15   :  { %518 = dma.done.wait [#allocation9], 3072  }
  0x16   :  { %519 = vsyncadd [#allocation9], 4294964224  ;;  %v104_v0 = vld [vmem:[#allocation5 + $0x10] sm:$0xff]  ;;  %v102_v1 = vld [vmem:[#allocation5] sm:$0xff]  ;;  %vm112_vm0 = vcmask 130048   ;;  %s531_s2 = smov 64  }
  0x17   :  { %130 = vmatpush.msra.mxu1 %v104_v0  ;;  %v101_v2 = vld [vmem:[#allocation2] sm:$0x3]  ;;  %v103_v4 = vld [vmem:[#allocation5 + $0x8] sm:$0xff]  ;;  %v106_v5 = vld [vmem:[#allocation7] sm:$0x3]  ;;  %vm208_vm5 = vcmask 523264  }
  0x18   :  { %v105_v3 = vld [vmem:[#allocation5 + $0x18] sm:$0xff]  ;;  %v108_v6 = vperm.slane %v106_v5, 0  ;;  %v109_v12 = vperm.slane %v106_v5, 1  ;;  %v195_v30 = vld [vmem:[#allocation8 + $0x60] sm:$0xff]  ;;  %v196_v31 = vld [vmem:[#allocation8 + $0x68] sm:$0xff]  ;;  %s532_s29 = smov [#allocation11]  }
  0x19   :  { %131 = vmatpush.msra.mxu1 %v102_v1  ;;  %v197_v28 = vld [vmem:[#allocation8 + $0x70] sm:$0xff]  ;;  %v198_v29 = vld [vmem:[#allocation8 + $0x78] sm:$0xff]  ;;  %v191_v34 = vld [vmem:[#allocation8 + $0x40] sm:$0xff]  ;;  %s321_s30 = sshll.u32 %s532_s29, 4  ;;  %s323_s10 = sshll.u32 %s611_s7, 4  ;;  %s322_s30 = int_to_ptr.vmem [resolvable:$true] %s321_s30  ;;  %s324_s10 = int_to_ptr.hbm [resolvable:$true] %s323_s10 }
  0x1a   :  { %335 = vmatmul.msk.f32.vlgmr.msra.gmra.mxu1 %vm112_vm0, %v101_v2  ;;  %219 = vmatpush.msra.mxu2 %v197_v28  ;;  %v193_v32 = vld [vmem:[#allocation8 + $0x50] sm:$0xff]  ;;  %v194_v33 = vld [vmem:[#allocation8 + $0x58] sm:$0xff]  ;;  %v192_v35 = vld [vmem:[#allocation8 + $0x48] sm:$0xff] }
  0x1b   :  { %150 = vmatpush.msrb.mxu1 %v105_v3  ;;  %239 = vmatpush.msra.mxu3 %v198_v29  ;;  %v189_v36 = vld [vmem:[#allocation8 + $0x30] sm:$0xff]  ;;  %v190_v37 = vld [vmem:[#allocation8 + $0x38] sm:$0xff]  ;;  %v187_v38 = vld [vmem:[#allocation8 + $0x20] sm:$0xff] }
  0x1c   :  { %220 = vmatpush.msra.mxu2 %v195_v30  ;;  %v188_v39 = vld [vmem:[#allocation8 + $0x28] sm:$0xff]  ;;  %v185_v40 = vld [vmem:[#allocation8 + $0x10] sm:$0xff]  ;;  %v186_v41 = vld [vmem:[#allocation8 + $0x18] sm:$0xff] }
  0x1d   :  { %151 = vmatpush.msrb.mxu1 %v103_v4  ;;  %240 = vmatpush.msra.mxu3 %v196_v31  ;;  %v183_v42 = vld [vmem:[#allocation8] sm:$0xff]  ;;  %v184_v43 = vld [vmem:[#allocation8 + $0x8] sm:$0xff]  ;;  %v199_v47 = vld [vmem:[%s608_s4] sm:$0x3] }
  0x1e   :  { %221 = vmatpush.msra.mxu2 %v193_v32  ;;  %v201_v48 = vperm.slane %v199_v47, 0  ;;  %v202_v54 = vperm.slane %v199_v47, 1 }
  0x1f   :  { %241 = vmatpush.msra.mxu3 %v194_v33 }
  0x20   :  { %222 = vmatpush.msra.mxu2 %v191_v34 }
  0x21   :  { %242 = vmatpush.msra.mxu3 %v192_v35 }
  0x22   :  { %336 = vmatmul.msk.f32.vlgmr.msrb.gmra.mxu1 %vm112_vm0, %v101_v2  ;;  %223 = vmatpush.msra.mxu2 %v189_v36 }
  0x23   :  { %243 = vmatpush.msra.mxu3 %v190_v37 }
  0x24   :  { %224 = vmatpush.msra.mxu2 %v187_v38 }
  0x25   :  { %244 = vmatpush.msra.mxu3 %v188_v39 }
  0x26   :  { %225 = vmatpush.msra.mxu2 %v185_v40 }
  0x27   :  { %245 = vmatpush.msra.mxu3 %v186_v41 }
  0x28   :  { %226 = vmatpush.msra.mxu2 %v183_v42 }
  0x29   :  { %246 = vmatpush.msra.mxu3 %v184_v43 }
  0x97   :  { %v133_v7 = vpop.f32.mrf.mxu1 }
  0x98   :  { %v134_v8 = vadd.f32 %v133_v7, %v108_v6  ;;  %v285_v6 = vld [vmem:[#allocation10 + $0x38] sm:$0xff]  ;;  %v284_v7 = vld [vmem:[#allocation10 + $0x30] sm:$0xff] }
  0x99   :  { %303 = vmatpush.msra.mxu0 %v285_v6 }
  0x9a   :  { %v337_v9 = vmul.f32 -1.442695, %v134_v8  ;;  %v283_v8 = vld [vmem:[#allocation10 + $0x28] sm:$0xff] }
  0x9b   :  { %304 = vmatpush.msra.mxu0 %v284_v7 }
  0x9c   :  { %354 = vpow2.f32 %v337_v9  ;;  %v282_v9 = vld [vmem:[#allocation10 + $0x20] sm:$0xff] }
  0x9d   :  { %305 = vmatpush.msra.mxu0 %v283_v8 }
  0x9f   :  { %v153_v13 = vpop.f32.mrf.mxu1  ;;  %306 = vmatpush.msra.mxu0 %v282_v9 }
  0xa0   :  { %v154_v14 = vadd.f32 %v153_v13, %v109_v12  ;;  %v279_v12 = vld [vmem:[#allocation10 + $0x8] sm:$0xff]  ;;  %v278_v13 = vld [vmem:[#allocation10] sm:$0xff] }
  0xa2   :  { %v355_v10 = vpop.eup %354 }
  0xa3   :  { %v159_v11 = vadd.f32 1.0, %v355_v10  ;;  %v281_v10 = vld [vmem:[#allocation10 + $0x18] sm:$0xff] }
  0xa4   :  { %307 = vmatpush.msra.mxu0 %v281_v10 }
  0xa5   :  { %356 = vrcp.f32 %v159_v11  ;;  %v171_v18 = vand.u32 2147483648, %v159_v11  ;;  %v169_v20 = vand.u32 2147483647, %v159_v11  ;;  %vm165_vm2 = vweird.f32 %v159_v11 }
  0xa6   :  { %358 = vtanh.f32 %v154_v14 }
  0xa7   :  { %v172_v23 = vor.u32 1.1754944e-38, %v171_v18  ;;  %vm170_vm4 = vcmp.eq.f32.partialorder %v169_v20, 8.507059e+37 }
  0xab   :  { %v357_v15 = vpop.eup %356 }
  0xac   :  { %v161_v16 = vmul.f32 %v357_v15, %v159_v11  ;;  %vm166_vm1 = vweird.f32 %v357_v15  ;;  %v359_v22 = vpop.eup %358  ;;  %v280_v11 = vld [vmem:[#allocation10 + $0x10] sm:$0xff] }
  0xad   :  { %vm167_vm3 = vmor %vm165_vm2, %vm166_vm1  ;;  %308 = vmatpush.msra.mxu0 %v280_v11 }
  0xae   :  { %v162_v17 = vsub.f32 1.0, %v161_v16 }
  0xaf   :  { %309 = vmatpush.msra.mxu0 %v279_v12 }
  0xb0   :  { %v163_v19 = vmul.f32 %v357_v15, %v162_v17  ;;  %v353_v17 = vld [vmem:[%s610_s6] ss:$0 sm:$0xff] }
  0xb1   :  { %310 = vmatpush.msra.mxu0 %v278_v13 }
  0xb2   :  { %v164_v21 = vadd.f32 %v357_v15, %v163_v19 }
  0xb4   :  { %v168_v24 = vsel %vm167_vm3, %v357_v15, %v164_v21 }
  0xb5   :  { %v173_v25 = vsel %vm170_vm4, %v172_v23, %v168_v24 }
  0xb6   :  { %v176_v26 = vmul.f32 %v359_v22, %v173_v25 }
  0xb8   :  { %360 = vtanh.f32 %v176_v26 }
  0xbe   :  { %v361_v27 = vpop.eup %360 }
  0xbf   :  { %179 = vrot.lane.b32.xlu0 %v361_v27, %s531_s2 }
 0x131   :  { %v180_v44 = vpop.permute.xlu0 %179 }
 0x132   :  { %v182_v45 = vmul.f32 %v180_v44, %v173_v25 }
 0x134   :  { %206 = vrot.lane.b32.xlu0 %v182_v45, %s531_s2 }
 0x1a6   :  { %v207_v46 = vpop.permute.xlu0 %206 }
 0x1a7   :  { %338 = vmatmul.msk.f32.vlgmr.msra.gmra.mxu2 %vm208_vm5, %v207_v46  ;;  %339 = vmatmul.msk.f32.vlgmr.msra.gmra.mxu3 %vm208_vm5, %v207_v46 }
 0x22a   :  { %v228_v49 = vpop.f32.mrf.mxu2  ;;  %v248_v55 = vpop.f32.mrf.mxu3 }
 0x22b   :  { %v229_v50 = vadd.f32 %v228_v49, %v201_v48  ;;  %v249_v57 = vadd.f32 %v248_v55, %v202_v54 }
 0x22d   :  { %v340_v51 = vmul.f32 -1.442695, %v229_v50 }
 0x22f   :  { %362 = vpow2.f32 %v340_v51 }
 0x235   :  { %v363_v52 = vpop.eup %362 }
 0x236   :  { %v254_v53 = vadd.f32 1.0, %v363_v52 }
 0x238   :  { %364 = vrcp.f32 %v254_v53  ;;  %v266_v60 = vand.u32 2147483648, %v254_v53  ;;  %v264_v62 = vand.u32 2147483647, %v254_v53  ;;  %vm260_vm7 = vweird.f32 %v254_v53 }
 0x239   :  { %366 = vtanh.f32 %v249_v57 }
 0x23a   :  { %v267_v0 = vor.u32 1.1754944e-38, %v266_v60  ;;  %vm265_vm9 = vcmp.eq.f32.partialorder %v264_v62, 8.507059e+37 }
 0x23e   :  { %v365_v56 = vpop.eup %364 }
 0x23f   :  { %v256_v58 = vmul.f32 %v365_v56, %v254_v53  ;;  %vm261_vm6 = vweird.f32 %v365_v56  ;;  %v367_v2 = vpop.eup %366 }
 0x240   :  { %vm262_vm8 = vmor %vm260_vm7, %vm261_vm6 }
 0x241   :  { %v257_v59 = vsub.f32 1.0, %v256_v58 }
 0x243   :  { %v258_v61 = vmul.f32 %v365_v56, %v257_v59 }
 0x245   :  { %v259_v63 = vadd.f32 %v365_v56, %v258_v61 }
 0x247   :  { %v263_v1 = vsel %vm262_vm8, %v365_v56, %v259_v63 }
 0x248   :  { %v268_v3 = vsel %vm265_vm9, %v267_v0, %v263_v1 }
 0x249   :  { %v271_v4 = vmul.f32 %v367_v2, %v268_v3 }
 0x24b   :  { %368 = vtanh.f32 %v271_v4 }
 0x251   :  { %v369_v5 = vpop.eup %368 }
 0x252   :  { %274 = vrot.lane.b32.xlu1 %v369_v5, %s531_s2 }
 0x2c4   :  { %v275_v14 = vpop.permute.xlu1 %274 }
 0x2c5   :  { %v277_v15 = vmul.f32 %v275_v14, %v268_v3 }
 0x2c7   :  { %291 = vrot.lane.b32.xlu1 %v277_v15, %s531_s2 }
 0x339   :  { %v292_v16 = vpop.permute.xlu1 %291 }
 0x33a   :  { %341 = vmatmul.msk.f32.vlgmr.msra.gmra.mxu0 %vm208_vm5, %v292_v16 }
 0x3b7   :  { %v312_v18 = vpop.f32.mrf.mxu0 }
 0x3b8   :  { %v313_v19 = vadd.f32 %v353_v17, %v312_v18 }
 0x3ba   :  { %315 = vst [vmem:[#allocation11] sm:$0x3] %v313_v19 }
 0x3bb   :  { %326 = dma.vmem_to_hbm [thread:$0]  %s322_s30, 32, %s324_s10, [#allocation4]  }
 0x3bc   :  { %520 = dma.done.wait [#allocation4], 32  }
 0x3bd   :  { %521 = vsyncadd [#allocation4], 4294967264 }
 0x3be   :  { %331 = vsyncpa [#allocation3], 1 }
 0x3bf   :  { %332 = vsyncpa [#allocation6], 1 }
 0x3c0   :  { %333 = vsyncpa [#allocation9], 1 }
 0x3c1   :  { %334 = vsyncpa [#allocation4], 1 }

</bundles_post_ra>
